<compile_context>
chip_gen: v6e
topology: v6e:2x2x1
jax: 0.10.0
libtpu: 0.0.40
codegen_flags: <defaults>
</compile_context>

<pallas_src>
import jax
import jax.numpy as jnp
from jax.experimental import pallas as pl
from jax.experimental.pallas import tpu as pltpu

_EPS = 1e-5

# VPU-vs-MXU crossover for the channel "matmul".
# TODO(synk): make generation-aware (~16 on v5e's 128-wide MXU, ~32 on v6e/v7x)
# and confirm with a bundle dump.
_VPU_FMA_MAX_CIN = 8

# Cast MXU operands to bf16 (f32 accumulate): bf16 is the native MXU format on
# all three generations (f32 matmul is multi-pass and much slower).  Relative
# error ~4e-3 on wide-channel outputs; flip to False if that exceeds budget.
_USE_BF16_MXU = True

# The Gram-statistics path writes a (Cin x Cin) block per tile; only use it
# where that is negligible next to the x-tile read.
_GRAM_MAX_CIN = 128


def _cost(flops, bytes_accessed):
    return pl.CostEstimate(flops=flops, transcendentals=0,
                           bytes_accessed=bytes_accessed)


def _round_up(a, b):
    return -(-a // b) * b


def _vmem_capacity_bytes():
    """Physical VMEM of the current TPU generation (conservative fallback)."""
    try:
        cap = int(pltpu.get_tpu_info().vmem_capacity_bytes)
        if cap > 0:
            return cap
    except Exception:
        pass
    return 64 * 1024 * 1024  # v7x-sized fallback: safe on every generation


def _channel_matmul(w, x):
    """w: [Cout, Cin] f32, x: [Cin, TS] f32 -> [Cout, TS] f32 (1x1 conv)."""
    cout, cin = w.shape
    if cin <= _VPU_FMA_MAX_CIN:
        # MXU would be a few % utilized at these widths; a handful of VPU
        # broadcast-FMAs is cheaper and the kernel is HBM-bound anyway.
        acc = w[:, 0:1] * x[0:1, :]
        for k in range(1, cin):
            acc = acc + w[:, k:k + 1] * x[k:k + 1, :]
        return acc
    if _USE_BF16_MXU:
        return jnp.dot(w.astype(jnp.bfloat16), x.astype(jnp.bfloat16),
                       preferred_element_type=jnp.float32)
    return jnp.dot(w, x, preferred_element_type=jnp.float32)


# ---------------- Pass-1 kernels (batch statistics) ----------------

def _x_stats_kernel(x_ref, stats_ref):
    """Gram path: per-tile sum(x) and x @ x^T (no W DMA, no Cout matmul).

    x_ref: [1, Cin, TS]; stats_ref: [1, 1, Cin, Cin+1]
      column 0       : sum over lanes of x
      columns 1..Cin : Gram = x @ x^T (symmetric)
    """
    xs = x_ref[0]                                     # [Cin, TS] f32
    cin = xs.shape[0]
    stats_ref[0, 0, :, 0:1] = jnp.sum(xs, axis=1, keepdims=True)
    if cin <= _VPU_FMA_MAX_CIN:
        for i in range(cin):
            stats_ref[0, 0, :, i + 1:i + 2] = jnp.sum(
                xs * xs[i:i + 1, :], axis=1, keepdims=True)
    else:
        gram = jax.lax.dot_general(xs, xs, (((1,), (1,)), ((), ())),
                                   preferred_element_type=jnp.float32)
        stats_ref[0, 0, :, 1:] = gram


def _y_stats_kernel(x_ref, w_ref, stats_ref):
    """Recompute path pass 1: packed per-tile sum / sum-of-squares of y=W@x."""
    y = _channel_matmul(w_ref[...], x_ref[0])         # [Cout, TS] f32
    stats_ref[0, 0, :, 0:1] = jnp.sum(y, axis=1, keepdims=True)
    stats_ref[0, 0, :, 1:2] = jnp.sum(y * y, axis=1, keepdims=True)


def _y_stats_emit_kernel(x_ref, w_ref, y_ref, stats_ref):
    """Staged path pass 1: emit y = W@x to HBM plus its packed per-tile stats."""
    y = _channel_matmul(w_ref[...], x_ref[0])         # [Cout, TS] f32
    y_ref[0] = y
    stats_ref[0, 0, :, 0:1] = jnp.sum(y, axis=1, keepdims=True)
    stats_ref[0, 0, :, 1:2] = jnp.sum(y * y, axis=1, keepdims=True)


# ---------------- Pass-2 kernels (normalize + ReLU) ----------------

def _matmul_shift_relu_kernel(x_ref, ws_ref, shift_ref, o_ref):
    """out = max((scale*W) @ x + shift, 0); BN scale pre-folded into W."""
    y = _channel_matmul(ws_ref[...], x_ref[0])
    o_ref[0] = jnp.maximum(y + shift_ref[...], jnp.float32(0.0))


def _scale_shift_relu_kernel(y_ref, scale_ref, shift_ref, o_ref):
    """Staged path pass 2: out = max(scale * y + shift, 0) on staged y."""
    o_ref[0] = jnp.maximum(y_ref[0] * scale_ref[...] + shift_ref[...],
                           jnp.float32(0.0))


# ---------------- Tiling / VMEM budgeting ----------------

def _pick_spatial_tile(hw, cin, cout, vmem_limit):
    """Pick the spatial (lane) tile TS.

    Returns (ts, hw_padded, j) with hw_padded = ts * j >= hw and ts % 128 == 0.
    Accounts for the resident (double-buffered) W block, double-buffering of
    the x and y/out tiles, and headroom for stats/shift blocks plus
    Pallas-internal scratch, against the current generation's VMEM.
    """
    # TODO(synk): for very large Cout*Cin (resident W approaching VMEM), add a
    # Cout grid axis and tile W over rows instead of shrinking TS further.
    resident = 2 * cout * cin * 4 + (2 << 20)          # 2x W + headroom
    avail = max(vmem_limit - resident, 0)
    per_col = 2 * 4 * (cin + cout)                     # dbl-buffered x + y/out, f32
    target = max(128, min(avail // per_col, 65536))
    target = (target // 128) * 128

    if hw <= target:
        ts = _round_up(hw, 128)
        return ts, ts, 1
    if hw % 128 == 0:
        # Largest divisor of hw that is a multiple of 128 and <= target (no pad).
        best = 128
        t = 128
        while t <= target:
            if hw % t == 0:
                best = t
            t += 128
        return best, hw, hw // best
    # Non-128-aligned spatial extent: zero-pad to balanced 128-aligned tiles
    # instead of a full-extent block (keeps tiles bounded and lane-aligned).
    j = -(-hw // target)
    ts = _round_up(-(-hw // j), 128)
    return ts, ts * j, j


def _balance_grid(n, ts, j):
    """v7x shards the parallel grid across 2 TensorCores; keep n*j even."""
    if (n * j) % 2 == 1 and ts % 256 == 0 and ts >= 1024:
        return ts // 2, 2 * j
    return ts, j


# ---------------- Public entry point ----------------

def conv_bn_relu_1x1(x_nchw, weight, bias, gamma, beta):
    """Forward of Conv2d(in, out, 1) -> BatchNorm2d(out) (batch stats) -> ReLU.

    x_nchw: [N, Cin, H, W].  weight: [Cout, Cin] (1x1 kernel squeezed).
    `bias` is accepted for API parity but unused: training-mode BatchNorm
    subtracts the batch mean of the conv output, which exactly cancels a
    per-channel bias.  (An eval-mode / running-stats variant must restore it.)
    """
    del bias  # mathematically dead under training-mode BN
    n, cin, h, w = x_nchw.shape
    cout = weight.shape[0]
    hw = h * w
    m_total = n * hw

    vmem_cap = _vmem_capacity_bytes()
    vmem_limit = max(32 << 20, min(int(vmem_cap * 0.7), 100 << 20))
    ts, hw_p, j = _pick_spatial_tile(hw, cin, cout, vmem_limit)
    ts, j = _balance_grid(n, ts, j)
    grid = (n, j)
    m_p = n * hw_p

    x3d = x_nchw.reshape(n, cin, hw).astype(jnp.float32)   # pure reshape
    if hw_p != hw:
        # Zero padding is stats-neutral: padded columns contribute 0 to every
        # partial sum and we divide by the true element count m_total.
        x3d = jnp.pad(x3d, ((0, 0), (0, 0), (0, hw_p - hw)))
    w2d = weight.astype(jnp.float32)                        # [Cout, Cin]

    x_map = lambda ni, ji: (ni, 0, ji)
    if ts < 512 and j >= 4 and cin * ts * 4 <= (4 << 20):
        # Tiny per-step compute: deepen x prefetch so its DMA latency hides.
        x_spec = pl.BlockSpec((1, cin, ts), x_map, pipeline_mode=pl.Buffered(3))
    else:
        x_spec = pl.BlockSpec((1, cin, ts), x_map)
    w_spec = pl.BlockSpec((cout, cin), lambda ni, ji: (0, 0))
    vec_spec = pl.BlockSpec((cout, 1), lambda ni, ji: (0, 0))
    yo_spec = pl.BlockSpec((1, cout, ts), lambda ni, ji: (ni, 0, ji))

    cparams = pltpu.CompilerParams(
        dimension_semantics=("parallel", "parallel"),
        vmem_limit_bytes=vmem_limit,
    )

    inv_m = jnp.float32(1.0 / m_total)
    eps = jnp.float32(_EPS)
    gamma32 = gamma.astype(jnp.float32)
    beta32 = beta.astype(jnp.float32)

    use_gram = (cout >= cin) and (cin <= _GRAM_MAX_CIN)
    use_staged = (not use_gram) and (cin > 2 * cout)

    # NOTE: var = E[y^2] - E[y]^2 in f32 can cancel when |mean| >> std; the
    # max(.,0) clamp keeps rsqrt finite.
    # TODO(synk): Welford-style tile combine for better-conditioned variance.

    if use_gram:
        # ---- Pass 1 (x-only): per-tile sum(x) and Gram = x x^T -------------
        stats_spec = pl.BlockSpec((1, 1, cin, cin + 1),
                                  lambda ni, ji: (ni, ji, 0, 0))
        stats = pl.pallas_call(
            _x_stats_kernel,
            grid=grid,
            in_specs=[x_spec],
            out_specs=stats_spec,
            out_shape=jax.ShapeDtypeStruct((n, j, cin, cin + 1), jnp.float32),
            compiler_params=cparams,
            cost_estimate=_cost(2 * m_p * cin * (cin + 1),
                                4 * (m_p * cin + n * j * cin * (cin + 1))),
        )(x3d)
        s = jnp.sum(stats, axis=(0, 1))                 # [Cin, Cin+1]
        mean_x = s[:, 0] * inv_m                        # [Cin]
        exxt = s[:, 1:] * inv_m                         # [Cin, Cin]
        mean_y = w2d @ mean_x                           # [Cout]
        ey2 = jnp.sum((w2d @ exxt) * w2d, axis=1)       # [Cout]
        var = jnp.maximum(ey2 - mean_y * mean_y, 0.0)
        scale = gamma32 * jax.lax.rsqrt(var + eps)
        shift = (beta32 - scale * mean_y).reshape(cout, 1)
        w_scaled = w2d * scale[:, None]                 # fold BN scale into W
        # ---- Pass 2: out = max((scale*W) @ x + shift, 0) -------------------
        out3d = pl.pallas_call(
            _matmul_shift_relu_kernel,
            grid=grid,
            in_specs=[x_spec, w_spec, vec_spec],
            out_specs=yo_spec,
            out_shape=jax.ShapeDtypeStruct((n, cout, hw_p), jnp.float32),
            compiler_params=cparams,
            cost_estimate=_cost(2 * m_p * cin * cout + 2 * m_p * cout,
                                4 * (m_p * cin + m_p * cout + cin * cout + cout)),
        )(x3d, w_scaled, shift)

    elif use_staged:
        # ---- Pass 1: y = W @ x staged to HBM + packed per-tile stats -------
        stats_spec = pl.BlockSpec((1, 1, cout, 2), lambda ni, ji: (ni, ji, 0, 0))
        y3d, stats = pl.pallas_call(
            _y_stats_emit_kernel,
            grid=grid,
            in_specs=[x_spec, w_spec],
            out_specs=[yo_spec, stats_spec],
            out_shape=[jax.ShapeDtypeStruct((n, cout, hw_p), jnp.float32),
                       jax.ShapeDtypeStruct((n, j, cout, 2), jnp.float32)],
            compiler_params=cparams,
            cost_estimate=_cost(2 * m_p * cin * cout + 3 * m_p * cout,
                                4 * (m_p * cin + m_p * cout + cin * cout
                                     + 2 * n * j * cout)),
        )(x3d, w2d)
        s = jnp.sum(stats, axis=(0, 1))                 # [Cout, 2]
        mean = s[:, 0] * inv_m
        var = jnp.maximum(s[:, 1] * inv_m - mean * mean, 0.0)
        scale = gamma32 * jax.lax.rsqrt(var + eps)
        shift = (beta32 - scale * mean).reshape(cout, 1)
        # ---- Pass 2: pure scale + shift + ReLU on staged y ------------------
        out3d = pl.pallas_call(
            _scale_shift_relu_kernel,
            grid=grid,
            in_specs=[yo_spec, vec_spec, vec_spec],
            out_specs=yo_spec,
            out_shape=jax.ShapeDtypeStruct((n, cout, hw_p), jnp.float32),
            compiler_params=cparams,
            cost_estimate=_cost(3 * m_p * cout, 4 * (2 * m_p * cout + 2 * cout)),
        )(y3d, scale.reshape(cout, 1), shift)

    else:
        # ---- Pass 1: packed per-tile stats of y = W @ x (recompute path) ---
        stats_spec = pl.BlockSpec((1, 1, cout, 2), lambda ni, ji: (ni, ji, 0, 0))
        stats = pl.pallas_call(
            _y_stats_kernel,
            grid=grid,
            in_specs=[x_spec, w_spec],
            out_specs=stats_spec,
            out_shape=jax.ShapeDtypeStruct((n, j, cout, 2), jnp.float32),
            compiler_params=cparams,
            cost_estimate=_cost(2 * m_p * cin * cout + 3 * m_p * cout,
                                4 * (m_p * cin + cin * cout + 2 * n * j * cout)),
        )(x3d, w2d)
        s = jnp.sum(stats, axis=(0, 1))                 # [Cout, 2]
        mean = s[:, 0] * inv_m
        var = jnp.maximum(s[:, 1] * inv_m - mean * mean, 0.0)
        scale = gamma32 * jax.lax.rsqrt(var + eps)
        shift = (beta32 - scale * mean).reshape(cout, 1)
        w_scaled = w2d * scale[:, None]
        # ---- Pass 2: out = max((scale*W) @ x + shift, 0) --------------------
        out3d = pl.pallas_call(
            _matmul_shift_relu_kernel,
            grid=grid,
            in_specs=[x_spec, w_spec, vec_spec],
            out_specs=yo_spec,
            out_shape=jax.ShapeDtypeStruct((n, cout, hw_p), jnp.float32),
            compiler_params=cparams,
            cost_estimate=_cost(2 * m_p * cin * cout + 2 * m_p * cout,
                                4 * (m_p * cin + m_p * cout + cin * cout + cout)),
        )(x3d, w_scaled, shift)

    if hw_p != hw:
        out3d = out3d[:, :, :hw]
    return out3d.reshape(n, cout, h, w)


# ---------------- Reference + tests ----------------

def _reference(x_nchw, weight, bias, gamma, beta):
    # Pure-JAX reference: Conv2d(1x1) -> BatchNorm2d(train mode) -> ReLU.
    y = jnp.einsum("nchw,oc->nohw", x_nchw, weight) + bias[None, :, None, None]
    mean = jnp.mean(y, axis=(0, 2, 3), keepdims=True)
    var = jnp.mean((y - mean) ** 2, axis=(0, 2, 3), keepdims=True)
    xhat = (y - mean) / jnp.sqrt(var + _EPS)
    out = gamma[None, :, None, None] * xhat + beta[None, :, None, None]
    return jnp.maximum(out, 0.0)


def _run_case(key, n, cin, cout, h, w, tol=1e-4):
    k_x, k_w, k_b, k_g, k_be = jax.random.split(key, 5)
    x = jax.random.normal(k_x, (n, cin, h, w), dtype=jnp.float32)
    # nn.Conv2d(in, out, 1) weight is [out, in, 1, 1]; squeezed to [Cout, Cin].
    weight = jax.random.normal(k_w, (cout, cin), dtype=jnp.float32) * 0.1
    bias = jax.random.normal(k_b, (cout,), dtype=jnp.float32) * 0.1
    gamma = 1.0 + 0.1 * jax.random.normal(k_g, (cout,), dtype=jnp.float32)
    beta = 0.1 * jax.random.normal(k_be, (cout,), dtype=jnp.float32)

    out = jax.block_until_ready(conv_bn_relu_1x1(x, weight, bias, gamma, beta))
    ref = _reference(x, weight, bias, gamma, beta)
    assert out.shape == (n, cout, h, w)
    err = float(jnp.max(jnp.abs(out - ref)))
    assert err < tol, (n, cin, cout, h, w, err)


if __name__ == "__main__":
    key = jax.random.PRNGKey(0)
    k1, k2, k3 = jax.random.split(key, 3)
    _run_case(k1, 2, 4, 8, 16, 16)   # Gram path (Cout >= Cin), VPU FMA matmul
    _run_case(k2, 2, 8, 3, 16, 16)   # staged-y path (Cin > 2*Cout)
    _run_case(k3, 1, 6, 4, 8, 8)     # recompute path + non-128-aligned H*W (padding)
    print("KERNEL_OK")
</pallas_src>

<mosaic_0001>
module attributes {stable_mosaic.version = 11 : i64} {
  func.func @_x_stats_kernel(%arg0: i32, %arg1: i32, %arg2: memref<1x4x256xf32, #tpu.memory_space<vmem>>, %arg3: memref<1x1x4x5xf32, #tpu.memory_space<vmem>>) attributes {dimension_semantics = [#tpu.dimension_semantics<parallel>, #tpu.dimension_semantics<parallel>], iteration_bounds = array<i64: 2, 1>, scalar_prefetch = 0 : i64, scratch_operands = 0 : i64, tpu.core_type = #tpu.core_type<tc>, window_params = [{transform_indices = @transform_0, window_bounds = array<i64: 1, 4, 256>}, {transform_indices = @transform_1, window_bounds = array<i64: 1, 1, 4, 5>}]} {
    %c0 = arith.constant 0 : index
    %c0_0 = arith.constant 0 : index
    %c0_1 = arith.constant 0 : index
    %0 = vector.load %arg2[%c0, %c0_0, %c0_1] : memref<1x4x256xf32, #tpu.memory_space<vmem>>, vector<1x4x256xf32>
    %1 = vector.shape_cast %0 : vector<1x4x256xf32> to vector<4x256xf32>
    %cst = arith.constant dense<0.000000e+00> : vector<4xf32>
    %2 = vector.multi_reduction <add>, %1, %cst [1] : vector<4x256xf32> to vector<4xf32>
    %3 = vector.shape_cast %2 : vector<4xf32> to vector<4x1xf32>
    %c0_2 = arith.constant 0 : index
    %c0_3 = arith.constant 0 : index
    %c0_4 = arith.constant 0 : index
    %c0_5 = arith.constant 0 : index
    %4 = vector.load %arg3[%c0_2, %c0_3, %c0_4, %c0_5] : memref<1x1x4x5xf32, #tpu.memory_space<vmem>>, vector<1x1x4x1xf32>
    %5 = vector.shape_cast %4 : vector<1x1x4x1xf32> to vector<4x1xf32>
    %6 = vector.shape_cast %3 : vector<4x1xf32> to vector<1x1x4x1xf32>
    tpu.vector_store %arg3[%c0_2, %c0_3, %c0_4, %c0_5], %6 {strides = array<i32>} : memref<1x1x4x5xf32, #tpu.memory_space<vmem>>, vector<1x1x4x1xf32>,
    %7 = vector.extract_strided_slice %1 {offsets = [0, 0], sizes = [1, 256], strides = [1, 1]} : vector<4x256xf32> to vector<1x256xf32>
    %8 = vector.broadcast %7 : vector<1x256xf32> to vector<4x256xf32>
    %9 = arith.mulf %1, %8 : vector<4x256xf32>
    %cst_6 = arith.constant dense<0.000000e+00> : vector<4xf32>
    %10 = vector.multi_reduction <add>, %9, %cst_6 [1] : vector<4x256xf32> to vector<4xf32>
    %11 = vector.shape_cast %10 : vector<4xf32> to vector<4x1xf32>
    %c0_7 = arith.constant 0 : index
    %c0_8 = arith.constant 0 : index
    %c0_9 = arith.constant 0 : index
    %c1 = arith.constant 1 : index
    %12 = vector.load %arg3[%c0_7, %c0_8, %c0_9, %c1] : memref<1x1x4x5xf32, #tpu.memory_space<vmem>>, vector<1x1x4x1xf32>
    %13 = vector.shape_cast %12 : vector<1x1x4x1xf32> to vector<4x1xf32>
    %14 = vector.shape_cast %11 : vector<4x1xf32> to vector<1x1x4x1xf32>
    tpu.vector_store %arg3[%c0_7, %c0_8, %c0_9, %c1], %14 {strides = array<i32>} : memref<1x1x4x5xf32, #tpu.memory_space<vmem>>, vector<1x1x4x1xf32>,
    %15 = vector.extract_strided_slice %1 {offsets = [1, 0], sizes = [1, 256], strides = [1, 1]} : vector<4x256xf32> to vector<1x256xf32>
    %16 = vector.broadcast %15 : vector<1x256xf32> to vector<4x256xf32>
    %17 = arith.mulf %1, %16 : vector<4x256xf32>
    %cst_10 = arith.constant dense<0.000000e+00> : vector<4xf32>
    %18 = vector.multi_reduction <add>, %17, %cst_10 [1] : vector<4x256xf32> to vector<4xf32>
    %19 = vector.shape_cast %18 : vector<4xf32> to vector<4x1xf32>
    %c0_11 = arith.constant 0 : index
    %c0_12 = arith.constant 0 : index
    %c0_13 = arith.constant 0 : index
    %c2 = arith.constant 2 : index
    %20 = vector.load %arg3[%c0_11, %c0_12, %c0_13, %c2] : memref<1x1x4x5xf32, #tpu.memory_space<vmem>>, vector<1x1x4x1xf32>
    %21 = vector.shape_cast %20 : vector<1x1x4x1xf32> to vector<4x1xf32>
    %22 = vector.shape_cast %19 : vector<4x1xf32> to vector<1x1x4x1xf32>
    tpu.vector_store %arg3[%c0_11, %c0_12, %c0_13, %c2], %22 {strides = array<i32>} : memref<1x1x4x5xf32, #tpu.memory_space<vmem>>, vector<1x1x4x1xf32>,
    %23 = vector.extract_strided_slice %1 {offsets = [2, 0], sizes = [1, 256], strides = [1, 1]} : vector<4x256xf32> to vector<1x256xf32>
    %24 = vector.broadcast %23 : vector<1x256xf32> to vector<4x256xf32>
    %25 = arith.mulf %1, %24 : vector<4x256xf32>
    %cst_14 = arith.constant dense<0.000000e+00> : vector<4xf32>
    %26 = vector.multi_reduction <add>, %25, %cst_14 [1] : vector<4x256xf32> to vector<4xf32>
    %27 = vector.shape_cast %26 : vector<4xf32> to vector<4x1xf32>
    %c0_15 = arith.constant 0 : index
    %c0_16 = arith.constant 0 : index
    %c0_17 = arith.constant 0 : index
    %c3 = arith.constant 3 : index
    %28 = vector.load %arg3[%c0_15, %c0_16, %c0_17, %c3] : memref<1x1x4x5xf32, #tpu.memory_space<vmem>>, vector<1x1x4x1xf32>
    %29 = vector.shape_cast %28 : vector<1x1x4x1xf32> to vector<4x1xf32>
    %30 = vector.shape_cast %27 : vector<4x1xf32> to vector<1x1x4x1xf32>
    tpu.vector_store %arg3[%c0_15, %c0_16, %c0_17, %c3], %30 {strides = array<i32>} : memref<1x1x4x5xf32, #tpu.memory_space<vmem>>, vector<1x1x4x1xf32>,
    %31 = vector.extract_strided_slice %1 {offsets = [3, 0], sizes = [1, 256], strides = [1, 1]} : vector<4x256xf32> to vector<1x256xf32>
    %32 = vector.broadcast %31 : vector<1x256xf32> to vector<4x256xf32>
    %33 = arith.mulf %1, %32 : vector<4x256xf32>
    %cst_18 = arith.constant dense<0.000000e+00> : vector<4xf32>
    %34 = vector.multi_reduction <add>, %33, %cst_18 [1] : vector<4x256xf32> to vector<4xf32>
    %35 = vector.shape_cast %34 : vector<4xf32> to vector<4x1xf32>
    %c0_19 = arith.constant 0 : index
    %c0_20 = arith.constant 0 : index
    %c0_21 = arith.constant 0 : index
    %c4 = arith.constant 4 : index
    %36 = vector.load %arg3[%c0_19, %c0_20, %c0_21, %c4] : memref<1x1x4x5xf32, #tpu.memory_space<vmem>>, vector<1x1x4x1xf32>
    %37 = vector.shape_cast %36 : vector<1x1x4x1xf32> to vector<4x1xf32>
    %38 = vector.shape_cast %35 : vector<4x1xf32> to vector<1x1x4x1xf32>
    tpu.vector_store %arg3[%c0_19, %c0_20, %c0_21, %c4], %38 {strides = array<i32>} : memref<1x1x4x5xf32, #tpu.memory_space<vmem>>, vector<1x1x4x1xf32>,
    return
  }
  func.func @transform_0(%arg0: i32, %arg1: i32) -> (i32, i32, i32) {
    %c0_i32 = arith.constant 0 : i32
    %c0_i32_0 = arith.constant 0 : i32
    return %arg0, %c0_i32, %arg1 : i32, i32, i32
  }
  func.func @transform_1(%arg0: i32, %arg1: i32) -> (i32, i32, i32, i32) {
    %c0_i32 = arith.constant 0 : i32
    %c0_i32_0 = arith.constant 0 : i32
    %c0_i32_1 = arith.constant 0 : i32
    return %arg0, %arg1, %c0_i32, %c0_i32_0 : i32, i32, i32, i32
  }
}

</mosaic_0001>

<bundles_post_ra>
// kernel: tpu_custom_call.1
= control target key start
LH: loop header
LB: loop body
LE: loop exit
PB: predicated region body
PF: predicated region fallthrough
CT: control target
= control target key end

     0   :  { %6 = vsyncpa [#allocation3], 0  ;;  %s750_s0 = inlined_call_operand.hbm [shape: f32[2,4,256], index: 0, kind: input, shape index: {}]   ;;  %s751_s1 = inlined_call_operand.hbm [shape: f32[2,1,4,5], index: 1, kind: output, shape index: {}]  }
   0x1   :  { %8 = vsyncpa [#allocation3 + $0x1], 0 }
   0x2   :  { %9 = vsyncpa [#allocation4], 0 }
   0x3   :  { %11 = vsyncpa [#allocation4 + $0x1], 0  ;;  %s593_s6 = smov 0   ;;  %s595_s7 = smov 0  }
   0x4   :  { %s597_s8 = smov 0   ;;  %s599_s9 = smov 0  }
   0x5   :  { %s601_s10 = smov 0   ;;  %s603_s11 = smov 0  }
   0x6 LB: > { %s393_s12 = sadd.s32 4294967295, %s579_s11   ;;  %s394_s13 = sadd.s32 4294967294, %s579_s11   ;;  %s579_s11 = sphi %s603_s11, %s17_s11   ;;  %s575_s10 = sphi %s601_s10, %s763_s10   ;;  %s571_s9 = sphi %s599_s9, %s762_s9   ;;  %s567_s8 = sphi %s597_s8, %s761_s8   ;;  %s563_s7 = sphi %s595_s7, %s760_s7   ;;  %s559_s6 = sphi %s593_s6, %s759_s6  }
   0x7   : > { %s29_s14 = sadd.s32 1, %s575_s10  ;;  %s38_s15 = sadd.s32 1, %s567_s8 }
   0x8   : > { %p31_p0 = scmp.ge.s32.totalorder %s29_s14, 2  ;;  %p45_p1 = scmp.ne.s32.totalorder %s567_s8, %s563_s7 }
   0x9   : > { %p46_p2 = scmp.eq.s32.totalorder %s579_s11, 0  ;;  %p51_p3 = scmp.ne.s32.totalorder %s563_s7, %s559_s6 }
   0xa   : > { %s765_s14 = smov (%p31_p0, %s29_s14), 0  ;;  %p52_p5 = scmp.eq.s32.totalorder %s393_s12, 0 }
   0xb   : > { %p634_p4 = por %p46_p2, %p45_p1  ;;  %s33_s17 = ssub.s32 %s575_s10, %s765_s14 }
   0xc   : > { %p77_p6 = scmp.eq.s32.totalorder %s393_s12, 1  ;;  %p36_p7 = scmp.eq.s32.totalorder %s33_s17, 0 }
   0xd   : > { %p640_p8 = por %p52_p5, %p51_p3  ;;  %p83_p10 = scmp.eq.s32.totalorder %s394_s13, 1 }
   0xe   : > { %p644_p9 = por %p77_p6, %p45_p1  ;;  %p420_p13 = scmp.lt.s32.totalorder %s579_s11, 2 }
   0xf   : > { %s649_s20 = scalar_select %p36_p7, %s567_s8, %s38_s15  }
  0x10   : > { %p651_p11 = por %p83_p10, %p51_p3  ;;  %s103_s22 = sand.u32 1, %s567_s8  }
  0x11   : > { %s397_s23 = sshll.u32 %s103_s22, 3  ;;  %s407_s24 = sshll.u32 %s575_s10, 7 }
  0x12   : > { %s755_s21 = scalar_select %p651_p11, 1, 0 }
  0x13   : > { %s115_s27 = scalar_lea.hbm %s750_s0, %s407_s24  ;;  %s107_s28 = scalar_lea.vmem [#allocation2], %s397_s23 }
  0x14   : > { %s117_s29 = sshll.u32 %s107_s28, 4  ;;  %p664_p0 = pnand %p420_p13, %p634_p4  ;;  %s118_s29 = int_to_ptr.vmem [resolvable:$true] %s117_s29 }
  0x15   : > { %p400_p1 = scmp.ge.s32.totalorder %s579_s11, 1  ;;  %p122_p2 = scmp.lt.s32.totalorder %s579_s11, 3 }
  0x16   : > { %s104_s2 = scalar_lea.sflag [#allocation3], %s103_s22  ;;  %p473_p3 = pneg %p664_p0 }
  0x17   : > { %s484_s3 = scalar_lea.vmem %s118_s29, 128  ;;  %s581_s4 = smov [#allocation2]  }
  0x18   : > { %p485_p5 = scmp.ne.s32.totalorder %s118_s29, %s484_s3  ;;  %s489_s5 = sshll.u32 %s581_s4, 4  ;;  %s490_s5 = int_to_ptr.vmem [resolvable:$false] %s489_s5 }
  0x19   : > { %s491_s12 = scalar_lea.vmem %s490_s5, 256  ;;  %p492_p10 = scmp.lt.s32.totalorder %s118_s29, %s490_s5 }
  0x1a   : > { %p487_p6 = pnand %p485_p5, %p473_p3  ;;  %p493_p12 = scmp.lt.s32.totalorder %s491_s12, %s484_s3 }
  0x1c   : > { %p488_p7 = pneg %p487_p6  ;;  %p494_p4 = por %p493_p12, %p492_p10 }
  0x1e   : > { %p495_p13 = pnand %p494_p4, %p488_p7 }
  0x20   : > { %498 = shalt.err (!%p495_p13)
}
  0x21   : > { %415 = dma.hbm_to_vmem [thread:$0]  (!%p664_p0), %s115_s27, 128, %s118_s29, %s104_s2  }
  0x22   : > { %p123_p11 = pnand %p400_p1, %p122_p2 }
  0x23   : > { %s679_s13 = sand.u32 (!%p123_p11), 1, %s563_s7  }
  0x24   : > { %126 = sbr.rel (%p123_p11) target bundleno = 217 (0xd9), region = 24  ;;  %s401_s15 = sshll.u32 (!%p123_p11), %s679_s13, 3 }
  0x25   : > { %s129_s16 = scalar_lea.sflag (!%p123_p11), [#allocation3], %s679_s13  ;;  %s132_s17 = scalar_lea.vmem (!%p123_p11), [#allocation2], %s401_s15 }
  0x29   : > { %550 = dma.done.wait (%p640_p8), %s129_s16, 128  }
  0x2a   : > { %552 = vsyncadd (%p640_p8), %s129_s16, 4294967168  ;;  %v164_v0 = vlaneseq  ;;  %vm156_vm0 = vcmask 1043456   ;;  %v152_v9 = vld [vmem:[%s132_s17] sm:$0xff]  ;;  %s402_s18 = sshll.u32 %s679_s13, 2  ;;  %vm162_vm1 = vcmask 3072   ;;  %vm195_vm2 = vcmask 11272  }
  0x2b   : > { %v154_v11 = vcombine.high %v152_v9, %v152_v9  ;;  %v157_v12 = vsel %vm156_vm0, %v152_v9, 0.0  ;;  %s150_s22 = scalar_lea.vmem [#allocation5], %s402_s18  ;;  %vm228_vm3 = vcmask 19472   ;;  %s404_s23 = sshll.u32 %s571_s9, 6  ;;  %vm261_vm4 = vcmask 27672  }
  0x2c   : > { %v165_v1 = vshrl.u32 %v164_v0, 7  ;;  %s311_s24 = sshll.u32 %s150_s22, 4  ;;  %vm294_vm5 = vcmask 35872   ;;  %s702_s27 = scalar_lea.hbm %s751_s1, %s404_s23  ;;  %s704_s24 = int_to_ptr.vmem [resolvable:$true] %s311_s24 }
  0x2d   : > { %v158_v19 = vsel %vm156_vm0, %v154_v11, 0.0  ;;  %s297_s9 = scalar_lea.sflag [#allocation4], %s679_s13  ;;  %s499_s28 = scalar_lea.vmem %s704_s24, 64 }
  0x2e   : > { %v199_v2 = vsub.s32 1, %v165_v1  ;;  %v203_v3 = vsub.s32 5, %v165_v1  ;;  %v166_v4 = vsub.s32 0, %v165_v1  ;;  %v170_v5 = vsub.s32 4, %v165_v1  ;;  %p500_p8 = scmp.ne.s32.totalorder %s704_s24, %s499_s28  ;;  %s582_s29 = smov [#allocation5]  }
  0x2f   : > { %v232_v6 = vsub.s32 2, %v165_v1  ;;  %v236_v7 = vsub.s32 6, %v165_v1  ;;  %v265_v8 = vsub.s32 3, %v165_v1  ;;  %v269_v10 = vsub.s32 7, %v165_v1  ;;  %s503_s30 = sshll.u32 %s582_s29, 4  ;;  %s504_s30 = int_to_ptr.vmem [resolvable:$false] %s503_s30 }
  0x30   : > { %v200_v13 = vrot.slane %v152_v9, %v199_v2  ;;  %v204_v14 = vrot.slane %v152_v9, %v203_v3  ;;  %v167_v15 = vrot.slane %v152_v9, %v166_v4  ;;  %v171_v16 = vrot.slane %v152_v9, %v170_v5  ;;  %p501_p11 = pnand %p500_p8, %p644_p9  ;;  %s505_s2 = scalar_lea.vmem %s504_s30, 128 }
  0x31   : > { %v233_v17 = vrot.slane %v152_v9, %v232_v6  ;;  %v237_v18 = vrot.slane %v152_v9, %v236_v7  ;;  %v266_v22 = vrot.slane %v152_v9, %v265_v8  ;;  %v159_v23 = vadd.f32 %v158_v19, %v157_v12  ;;  %p506_p0 = scmp.lt.s32.totalorder %s704_s24, %s504_s30  ;;  %p507_p1 = scmp.lt.s32.totalorder %s505_s2, %s499_s28 }
  0x32   : > { %v210_v20 = vrot.slane %v200_v13, %v199_v2  ;;  %v214_v21 = vrot.slane %v204_v14, %v199_v2  ;;  %v177_v24 = vrot.slane %v167_v15, %v166_v4  ;;  %v181_v25 = vrot.slane %v171_v16, %v166_v4  ;;  %p502_p12 = pneg %p501_p11 }
  0x33   : > { %v243_v26 = vrot.slane %v233_v17, %v232_v6  ;;  %v247_v28 = vrot.slane %v237_v18, %v232_v6  ;;  %v270_v29 = vrot.slane %v152_v9, %v269_v10  ;;  %v276_v30 = vrot.slane %v266_v22, %v265_v8  ;;  %160 = vadd.xlane.f32.xlu0 %v159_v23  ;;  %p508_p2 = por %p507_p1, %p506_p0 }
  0x34   : > { %v217_v27 = vcombine.low %v210_v20, %v214_v21  ;;  %v184_v31 = vcombine.low %v177_v24, %v181_v25 }
  0x35   : > { %v250_v33 = vcombine.low %v243_v26, %v247_v28  ;;  %v280_v34 = vrot.slane %v270_v29, %v265_v8  ;;  %p509_p3 = pnand %p508_p2, %p502_p12 }
  0x36   : > { %v219_v32 = vmul.f32 %v217_v27, %v152_v9  ;;  %v186_v35 = vmul.f32 %v184_v31, %v152_v9 }
  0x37   : > { %v252_v38 = vmul.f32 %v250_v33, %v152_v9  ;;  %v283_v39 = vcombine.low %v276_v30, %v280_v34 }
  0x38   : > { %v221_v36 = vcombine.high %v219_v32, %v219_v32  ;;  %v223_v37 = vsel %vm156_vm0, %v219_v32, 0.0  ;;  %v188_v40 = vcombine.high %v186_v35, %v186_v35  ;;  %v190_v41 = vsel %vm156_vm0, %v186_v35, 0.0 }
  0x39   : > { %v254_v43 = vcombine.high %v252_v38, %v252_v38  ;;  %v256_v44 = vsel %vm156_vm0, %v252_v38, 0.0  ;;  %v285_v45 = vmul.f32 %v283_v39, %v152_v9 }
  0x3a   : > { %v224_v42 = vsel %vm156_vm0, %v221_v36, 0.0  ;;  %v191_v47 = vsel %vm156_vm0, %v188_v40, 0.0 }
  0x3b   : > { %v225_v46 = vadd.f32 %v224_v42, %v223_v37  ;;  %v192_v48 = vadd.f32 %v191_v47, %v190_v41  ;;  %v257_v49 = vsel %vm156_vm0, %v254_v43, 0.0  ;;  %v287_v50 = vcombine.high %v285_v45, %v285_v45 }
  0x3c   : > { %v289_v51 = vsel %vm156_vm0, %v285_v45, 0.0  ;;  %v258_v52 = vadd.f32 %v257_v49, %v256_v44 }
  0x3d   : > { %226 = vadd.xlane.f32.xlu1 %v225_v46  ;;  %193 = vadd.xlane.f32.xlu0 %v192_v48  ;;  %v290_v53 = vsel %vm156_vm0, %v287_v50, 0.0 }
  0x3e   : > { %v291_v54 = vadd.f32 %v290_v53, %v289_v51 }
  0x41   : > { %259 = vadd.xlane.f32.xlu1 %v258_v52  ;;  %292 = vadd.xlane.f32.xlu0 %v291_v54 }
  0xbc   : > { %v161_v55 = vpop.xlane.xlu0 %160 }
  0xbd   : > { %163 = vst.msk [vmem:[%s150_s22] sm:$0xf] %vm162_vm1, %v161_v55 }
  0xc6   : > { %v227_v56 = vpop.xlane.xlu1 %226  ;;  %v194_v57 = vpop.xlane.xlu0 %193 }
  0xc7   : > { %196 = vst.msk [vmem:[%s150_s22] sm:$0xf] %vm195_vm2, %v194_v57 }
  0xc8   : > { %229 = vst.msk [vmem:[%s150_s22] sm:$0xf] %vm228_vm3, %v227_v56 }
  0xca   : > { %v260_v58 = vpop.xlane.xlu1 %259  ;;  %v293_v59 = vpop.xlane.xlu0 %292 }
  0xcb   : > { %262 = vst.msk [vmem:[%s150_s22] sm:$0xf] %vm261_vm4, %v260_v58 }
  0xcc   : > { %295 = vst.msk [vmem:[%s150_s22] sm:$0xf] %vm294_vm5, %v293_v59 }
  0xcd   : > { %512 = shalt.err (!%p509_p3)
}
  0xce   : > { %s513_s3 = scalar_lea.hbm %s702_s27, 64  ;;  %s517_s12 = scalar_lea.hbm %s751_s1, 128 }
  0xcf   : > { %p514_p5 = scmp.ne.s32.totalorder %s702_s27, %s513_s3  ;;  %p518_p10 = scmp.lt.s32.totalorder %s702_s27, %s751_s1 }
  0xd0   : > { %p519_p4 = scmp.lt.s32.totalorder %s517_s12, %s513_s3 }
  0xd1   : > { %p515_p6 = pnand %p514_p5, %p644_p9 }
  0xd2   : > { %p520_p13 = por %p519_p4, %p518_p10 }
  0xd3   : > { %p516_p7 = pneg %p515_p6 }
  0xd5   : > { %p521_p8 = pnand %p520_p13, %p516_p7 }
  0xd7   : > { %524 = shalt.err (!%p521_p8)
}
  0xd8   : > { %410 = dma.vmem_to_hbm [thread:$0]  (%p644_p9), %s704_s24, 64, %s702_s27, %s297_s9  }
  0xd9 PF: > { %s323_s16 = sand.u32 1, %s559_s6   ;;  %p757_p11 = scmp.ne.s32.totalorder %s755_s21, 0 }
  0xda   : > { %p758_p12 = scmp.ge.s32.totalorder %s579_s11, 2  ;;  %s324_s17 = scalar_lea.sflag [#allocation4], %s323_s16 }
  0xdc   : > { %p417_p0 = pnand %p758_p12, %p757_p11 }
  0xde   : > { %p418_p1 = pneg %p417_p0 }
  0xe0   : > { %554 = dma.done.wait (%p418_p1), %s324_s17, 64  }
  0xe1   : > { %556 = vsyncadd (%p418_p1), %s324_s17, 4294967232  ;;  %s17_s11 = sadd.s32 1, %s579_s11   ;;  %s759_s6 = smov %s563_s7 }
  0xe2   : > { %p14_p2 = scmp.ge.s32.totalorder %s17_s11, 4   ;;  %s760_s7 = smov %s567_s8 }
  0xe3   : > { %s761_s8 = smov %s649_s20  ;;  %s762_s9 = smov %s575_s10 }
  0xe4   : > { %s763_s10 = smov %s765_s14  ;;  %16 = sbr.rel (!%p14_p2) target bundleno = 6 (0x6), region = 69 }
  0xe9   :  { %329 = vsyncpa [#allocation3], 1 }
  0xea   :  { %331 = vsyncpa [#allocation3 + $0x1], 1 }
  0xeb   :  { %332 = vsyncpa [#allocation4], 1 }
  0xec   :  { %334 = vsyncpa [#allocation4 + $0x1], 1 }

</bundles_post_ra>
